<compile_context>
chip_gen: v6e
topology: v6e:2x2x1
jax: 0.10.0
libtpu: 0.0.40
codegen_flags: <defaults>
</compile_context>

<pallas_src>
import functools

import jax
import jax.numpy as jnp
from jax.experimental import pallas as pl
from jax.experimental.pallas import tpu as pltpu

LANE = 128
_MIB = 1024 * 1024


def _round_up(x: int, m: int) -> int:
    return ((x + m - 1) // m) * m


def _vmem_capacity_bytes() -> int:
    """Per-core VMEM capacity; conservative fallback if the query is unavailable."""
    try:
        return int(pltpu.get_tpu_info().vmem_capacity_bytes)
    except Exception:
        return 64 * _MIB  # v7x per-TensorCore VMEM (most restrictive generation)


def _make_mlp_kernel(num_layers: int):
    """Fused MLP kernel body: x -> (Linear -> ReLU) * (L-1) -> Linear, one row tile."""

    def kernel(*refs):
        x_ref = refs[0]
        w_refs = refs[1:1 + num_layers]
        b_refs = refs[1 + num_layers:1 + 2 * num_layers]
        o_ref = refs[-1]

        h = x_ref[...]                                               # bf16 row tile
        for i in range(num_layers):
            acc = jnp.dot(h, w_refs[i][...],
                          preferred_element_type=jnp.float32)       # MXU, f32 accumulate
            acc = acc + b_refs[i][...]                               # f32 epilogue
            if i < num_layers - 1:
                acc = jnp.maximum(acc, 0.0)                          # ReLU
                h = acc.astype(x_ref.dtype)                          # back to bf16 for MXU
            else:
                h = acc
        o_ref[...] = h.astype(o_ref.dtype)

    return kernel


def prepare_mlp_params(weights, biases, *, compute_dtype=jnp.bfloat16, lane=LANE):
    """One-time weight prep: PyTorch (O,K) -> (K,O), pad to lane multiples, bf16 cast."""
    num_layers = len(weights)
    assert len(biases) == num_layers and num_layers >= 1
    dims = [int(weights[0].shape[1])] + [int(w.shape[0]) for w in weights]
    pdims = [_round_up(d, lane) for d in dims]

    w_p, b_p = [], []
    for i, (w, b) in enumerate(zip(weights, biases)):
        wt = jnp.transpose(w).astype(compute_dtype)                  # (K, O): lane-dense O
        wt = jnp.pad(wt, ((0, pdims[i] - dims[i]), (0, pdims[i + 1] - dims[i + 1])))
        w_p.append(wt)
        bp = jnp.pad(b.astype(jnp.float32), (0, pdims[i + 1] - dims[i + 1]))
        b_p.append(bp.reshape(1, pdims[i + 1]))                      # f32 bias, (1, O)

    return {"weights": w_p, "biases": b_p, "dims": tuple(dims), "pdims": tuple(pdims),
            "compute_dtype": compute_dtype}


def mlp_pallas_apply(x, params, *, block_m=512, out_dtype=jnp.float32):
    """Fused MLP forward: x (..., input_dim) -> (..., output_dim)."""
    w_p, b_p = params["weights"], params["biases"]
    dims, pdims = params["dims"], params["pdims"]
    compute_dtype = params["compute_dtype"]
    num_layers = len(w_p)

    orig_shape = x.shape
    din, dout = dims[0], dims[-1]
    assert int(orig_shape[-1]) == din
    M = 1
    for s in orig_shape[:-1]:
        M *= int(s)

    cd_bytes = jnp.dtype(compute_dtype).itemsize
    out_bytes = jnp.dtype(out_dtype).itemsize

    # --- generation-aware VMEM budget ------------------------------------------
    cap = _vmem_capacity_bytes()
    budget = int(0.70 * cap)          # ~45 MiB on v7x (64 MiB/TC), ~90 MiB on v5e/v6e

    def step_bytes(bm):
        # streamed tiles are double-buffered by the BlockSpec pipeline
        io = 2 * bm * pdims[0] * cd_bytes + 2 * bm * pdims[-1] * out_bytes
        # resident weights/biases: Pallas still allocates 2 buffers per input spec
        wts = 2 * (sum(w.size * cd_bytes for w in w_p) + sum(b.size * 4 for b in b_p))
        # live f32 intermediates of the unrolled layer loop (rough upper bound)
        live = 2 * sum(bm * pd * 4 for pd in pdims)
        return io + wts + live

    # --- row-tile selection ------------------------------------------------------
    # Keep >= 2 grid steps when M allows it so both v7x TensorCores get work.
    two_core_cap = max(256, _round_up(-(-M // 2), 256))
    bm = min(block_m, two_core_cap, _round_up(M, 8))
    bm = max(8, (bm // 8) * 8)
    while bm > 8 and step_bytes(bm) > budget:
        bm = max(8, ((bm // 2) // 8) * 8)
    if step_bytes(bm) > budget:
        # TODO(synk): add a weight-streaming fallback (pltpu.emit_pipeline over K/O weight
        # tiles with an f32 accumulator) for hidden dims too large to keep resident,
        # mainly relevant on v7x's 64 MiB/TC VMEM.
        raise ValueError("MLP weights too large to keep resident in VMEM on this TPU.")
    M_pad = _round_up(M, bm)

    # --- stream x as bf16; pad rows / features only when needed -------------------
    x2 = x.reshape(M, din)
    if x2.dtype != compute_dtype:
        x2 = x2.astype(compute_dtype)            # halves the dominant HBM read
    pad_rows, pad_cols = M_pad - M, pdims[0] - din
    if pad_rows or pad_cols:
        x2 = jnp.pad(x2, ((0, pad_rows), (0, pad_cols)))

    # --- specs ---------------------------------------------------------------------
    in_specs = [pl.BlockSpec((bm, pdims[0]), lambda i: (i, 0))]       # streamed x tile
    for li in range(num_layers):
        ki, oi = pdims[li], pdims[li + 1]
        in_specs.append(pl.BlockSpec((ki, oi), lambda i: (0, 0)))     # resident weight
    for li in range(num_layers):
        oi = pdims[li + 1]
        in_specs.append(pl.BlockSpec((1, oi), lambda i: (0, 0)))      # resident bias
    out_spec = pl.BlockSpec((bm, pdims[-1]), lambda i: (i, 0))

    vmem_limit = int(min(0.9 * cap, max(2 * step_bytes(bm), 32 * _MIB)))

    out = pl.pallas_call(
        _make_mlp_kernel(num_layers),
        out_shape=jax.ShapeDtypeStruct((M_pad, pdims[-1]), out_dtype),
        grid=(M_pad // bm,),
        in_specs=in_specs,
        out_specs=out_spec,
        compiler_params=pltpu.CompilerParams(
            dimension_semantics=("parallel",),
            vmem_limit_bytes=vmem_limit),
    )(x2, *w_p, *b_p)

    return out[:M, :dout].reshape(*orig_shape[:-1], dout)


def mlp_pallas(x, weights, biases, **kwargs):
    """Convenience one-shot path (prep + apply). Prefer prepare+apply for repeated calls."""
    return mlp_pallas_apply(x, prepare_mlp_params(weights, biases), **kwargs)


# ----------------------------------------------------------------------------
# Demo / self-test
# ----------------------------------------------------------------------------

if __name__ == "__main__":
    # MLP(input_dim=32, hidden_dim=64, output_dim=4, num_layers=3) on x:(2, 8, 32)
    input_dim, hidden_dim, output_dim, num_layers = 32, 64, 4, 3
    batch, seq = 2, 8

    key = jax.random.PRNGKey(0)
    keys = jax.random.split(key, 1 + 2 * num_layers)
    x = jax.random.normal(keys[0], (batch, seq, input_dim), jnp.float32)

    dims = [input_dim] + [hidden_dim] * (num_layers - 1) + [output_dim]
    weights, biases = [], []
    for i in range(num_layers):
        bound = 1.0 / (dims[i] ** 0.5)                 # PyTorch nn.Linear default init range
        w = jax.random.uniform(keys[1 + 2 * i], (dims[i + 1], dims[i]),
                               jnp.float32, -bound, bound)
        b = jax.random.uniform(keys[2 + 2 * i], (dims[i + 1],),
                               jnp.float32, -bound, bound)
        weights.append(w)
        biases.append(b)

    # Hoisted weight prep (done once), jitted forward so cast/pad/slice fuse around the kernel.
    params = prepare_mlp_params(weights, biases)
    fwd = jax.jit(functools.partial(mlp_pallas_apply, params=params))
    out = fwd(x)
    jax.block_until_ready(out)

    # pure-JAX f32 reference (bf16-matmul tolerance)
    ref = x
    for i in range(num_layers):
        ref = ref @ weights[i].T + biases[i]
        if i < num_layers - 1:
            ref = jnp.maximum(ref, 0.0)

    assert out.shape == (batch, seq, output_dim)
    max_err = float(jnp.max(jnp.abs(out - ref)))
    assert bool(jnp.all(jnp.isfinite(out))) and max_err < 5e-2, f"max abs err {max_err}"
    print("KERNEL_OK")
</pallas_src>

<mosaic_0001>
module attributes {stable_mosaic.version = 11 : i64} {
  func.func @kernel(%arg0: i32, %arg1: memref<16x128xbf16, #tpu.memory_space<vmem>>, %arg2: memref<128x128xbf16, #tpu.memory_space<vmem>>, %arg3: memref<128x128xbf16, #tpu.memory_space<vmem>>, %arg4: memref<128x128xbf16, #tpu.memory_space<vmem>>, %arg5: memref<1x128xf32, #tpu.memory_space<vmem>>, %arg6: memref<1x128xf32, #tpu.memory_space<vmem>>, %arg7: memref<1x128xf32, #tpu.memory_space<vmem>>, %arg8: memref<16x128xf32, #tpu.memory_space<vmem>>) attributes {dimension_semantics = [#tpu.dimension_semantics<parallel>], iteration_bounds = array<i64: 1>, scalar_prefetch = 0 : i64, scratch_operands = 0 : i64, tpu.core_type = #tpu.core_type<tc>, window_params = [{transform_indices = @transform_0, window_bounds = array<i64: 16, 128>}, {pipeline_mode = #tpu.pipeline_mode<synchronous>, transform_indices = @transform_1, window_bounds = array<i64: 128, 128>}, {pipeline_mode = #tpu.pipeline_mode<synchronous>, transform_indices = @transform_2, window_bounds = array<i64: 128, 128>}, {pipeline_mode = #tpu.pipeline_mode<synchronous>, transform_indices = @transform_3, window_bounds = array<i64: 128, 128>}, {pipeline_mode = #tpu.pipeline_mode<synchronous>, transform_indices = @transform_4, window_bounds = array<i64: 1, 128>}, {pipeline_mode = #tpu.pipeline_mode<synchronous>, transform_indices = @transform_5, window_bounds = array<i64: 1, 128>}, {pipeline_mode = #tpu.pipeline_mode<synchronous>, transform_indices = @transform_6, window_bounds = array<i64: 1, 128>}, {transform_indices = @transform_7, window_bounds = array<i64: 16, 128>}]} {
    %c0 = arith.constant 0 : index
    %c0_0 = arith.constant 0 : index
    %0 = vector.load %arg1[%c0, %c0_0] : memref<16x128xbf16, #tpu.memory_space<vmem>>, vector<16x128xbf16>
    %c0_1 = arith.constant 0 : index
    %c0_2 = arith.constant 0 : index
    %1 = vector.load %arg2[%c0_1, %c0_2] : memref<128x128xbf16, #tpu.memory_space<vmem>>, vector<128x128xbf16>
    %cst = arith.constant dense<0.000000e+00> : vector<16x128xf32>
    %2 = tpu.matmul %0, %1, %cst {dimension_numbers = #tpu.dot_dimension_numbers<[1], [0], [0], [1], [0, 0, 1, 1], [], []>} : vector<16x128xbf16>, vector<128x128xbf16>, vector<16x128xf32> -> vector<16x128xf32>
    %c0_3 = arith.constant 0 : index
    %c0_4 = arith.constant 0 : index
    %3 = vector.load %arg5[%c0_3, %c0_4] : memref<1x128xf32, #tpu.memory_space<vmem>>, vector<1x128xf32>
    %4 = vector.broadcast %3 : vector<1x128xf32> to vector<16x128xf32>
    %5 = arith.addf %2, %4 : vector<16x128xf32>
    %cst_5 = arith.constant 0.000000e+00 : f32
    %6 = vector.broadcast %cst_5 : f32 to vector<16x128xf32>
    %7 = arith.maximumf %5, %6 : vector<16x128xf32>
    %8 = arith.truncf %7 : vector<16x128xf32> to vector<16x128xbf16>
    %c0_6 = arith.constant 0 : index
    %c0_7 = arith.constant 0 : index
    %9 = vector.load %arg3[%c0_6, %c0_7] : memref<128x128xbf16, #tpu.memory_space<vmem>>, vector<128x128xbf16>
    %cst_8 = arith.constant dense<0.000000e+00> : vector<16x128xf32>
    %10 = tpu.matmul %8, %9, %cst_8 {dimension_numbers = #tpu.dot_dimension_numbers<[1], [0], [0], [1], [0, 0, 1, 1], [], []>} : vector<16x128xbf16>, vector<128x128xbf16>, vector<16x128xf32> -> vector<16x128xf32>
    %c0_9 = arith.constant 0 : index
    %c0_10 = arith.constant 0 : index
    %11 = vector.load %arg6[%c0_9, %c0_10] : memref<1x128xf32, #tpu.memory_space<vmem>>, vector<1x128xf32>
    %12 = vector.broadcast %11 : vector<1x128xf32> to vector<16x128xf32>
    %13 = arith.addf %10, %12 : vector<16x128xf32>
    %cst_11 = arith.constant 0.000000e+00 : f32
    %14 = vector.broadcast %cst_11 : f32 to vector<16x128xf32>
    %15 = arith.maximumf %13, %14 : vector<16x128xf32>
    %16 = arith.truncf %15 : vector<16x128xf32> to vector<16x128xbf16>
    %c0_12 = arith.constant 0 : index
    %c0_13 = arith.constant 0 : index
    %17 = vector.load %arg4[%c0_12, %c0_13] : memref<128x128xbf16, #tpu.memory_space<vmem>>, vector<128x128xbf16>
    %cst_14 = arith.constant dense<0.000000e+00> : vector<16x128xf32>
    %18 = tpu.matmul %16, %17, %cst_14 {dimension_numbers = #tpu.dot_dimension_numbers<[1], [0], [0], [1], [0, 0, 1, 1], [], []>} : vector<16x128xbf16>, vector<128x128xbf16>, vector<16x128xf32> -> vector<16x128xf32>
    %c0_15 = arith.constant 0 : index
    %c0_16 = arith.constant 0 : index
    %19 = vector.load %arg7[%c0_15, %c0_16] : memref<1x128xf32, #tpu.memory_space<vmem>>, vector<1x128xf32>
    %20 = vector.broadcast %19 : vector<1x128xf32> to vector<16x128xf32>
    %21 = arith.addf %18, %20 : vector<16x128xf32>
    %c0_17 = arith.constant 0 : index
    %c0_18 = arith.constant 0 : index
    %22 = vector.load %arg8[%c0_17, %c0_18] : memref<16x128xf32, #tpu.memory_space<vmem>>, vector<16x128xf32>
    tpu.vector_store %arg8[%c0_17, %c0_18], %21 {strides = array<i32>} : memref<16x128xf32, #tpu.memory_space<vmem>>, vector<16x128xf32>,
    return
  }
  func.func @transform_0(%arg0: i32) -> (i32, i32) {
    %c0_i32 = arith.constant 0 : i32
    %c0_i32_0 = arith.constant 0 : i32
    return %arg0, %c0_i32 : i32, i32
  }
  func.func @transform_1(%arg0: i32) -> (i32, i32) {
    %c0_i32 = arith.constant 0 : i32
    %c0_i32_0 = arith.constant 0 : i32
    %c0_i32_1 = arith.constant 0 : i32
    return %c0_i32, %c0_i32_0 : i32, i32
  }
  func.func @transform_2(%arg0: i32) -> (i32, i32) {
    %c0_i32 = arith.constant 0 : i32
    %c0_i32_0 = arith.constant 0 : i32
    %c0_i32_1 = arith.constant 0 : i32
    return %c0_i32, %c0_i32_0 : i32, i32
  }
  func.func @transform_3(%arg0: i32) -> (i32, i32) {
    %c0_i32 = arith.constant 0 : i32
    %c0_i32_0 = arith.constant 0 : i32
    %c0_i32_1 = arith.constant 0 : i32
    return %c0_i32, %c0_i32_0 : i32, i32
  }
  func.func @transform_4(%arg0: i32) -> (i32, i32) {
    %c0_i32 = arith.constant 0 : i32
    %c0_i32_0 = arith.constant 0 : i32
    %c0_i32_1 = arith.constant 0 : i32
    return %c0_i32, %c0_i32_0 : i32, i32
  }
  func.func @transform_5(%arg0: i32) -> (i32, i32) {
    %c0_i32 = arith.constant 0 : i32
    %c0_i32_0 = arith.constant 0 : i32
    %c0_i32_1 = arith.constant 0 : i32
    return %c0_i32, %c0_i32_0 : i32, i32
  }
  func.func @transform_6(%arg0: i32) -> (i32, i32) {
    %c0_i32 = arith.constant 0 : i32
    %c0_i32_0 = arith.constant 0 : i32
    %c0_i32_1 = arith.constant 0 : i32
    return %c0_i32, %c0_i32_0 : i32, i32
  }
  func.func @transform_7(%arg0: i32) -> (i32, i32) {
    %c0_i32 = arith.constant 0 : i32
    %c0_i32_0 = arith.constant 0 : i32
    return %arg0, %c0_i32 : i32, i32
  }
}

</mosaic_0001>

<bundles_post_ra>
// kernel: mlp_pallas_apply.1
= control target key start
LH: loop header
LB: loop body
LE: loop exit
PB: predicated region body
PF: predicated region fallthrough
CT: control target
= control target key end

     0   :  { %12 = vsyncpa [#allocation3], 0  ;;  %s741_s0 = inlined_call_operand.vmem [shape: bf16[16,128], index: 0, kind: input, shape index: {}]   ;;  %s742_s1 = inlined_call_operand.hbm [shape: bf16[128,128], index: 1, kind: input, shape index: {}]   ;;  %s743_s2 = inlined_call_operand.hbm [shape: bf16[128,128], index: 2, kind: input, shape index: {}]   ;;  %s744_s3 = inlined_call_operand.hbm [shape: bf16[128,128], index: 3, kind: input, shape index: {}]   ;;  %s745_s4 = inlined_call_operand.vmem [shape: f32[1,128], index: 4, kind: input, shape index: {}]   ;;  %s746_s5 = inlined_call_operand.vmem [shape: f32[1,128], index: 5, kind: input, shape index: {}]   ;;  %s747_s6 = inlined_call_operand.vmem [shape: f32[1,128], index: 6, kind: input, shape index: {}]   ;;  %s748_s7 = inlined_call_operand.vmem [shape: f32[16,128], index: 7, kind: output, shape index: {}]  }
   0x1   :  { %13 = vsyncpa [#allocation5], 0  ;;  %s637_s24 = smov [#allocation4]   ;;  %s638_s26 = smov [#allocation2]  }
   0x2   :  { %s33_s25 = sshll.u32 %s637_s24, 4  ;;  %s21_s27 = sshll.u32 %s638_s26, 4  ;;  %s34_s25 = int_to_ptr.vmem [resolvable:$true] %s33_s25  ;;  %s22_s27 = int_to_ptr.vmem [resolvable:$true] %s21_s27 }
   0x3   :  { %s581_s28 = scalar_lea.vmem %s34_s25, 1024  ;;  %p586_p1 = scmp.lt.s32.totalorder %s34_s25, %s34_s25 }
   0x4   :  { %p582_p0 = scmp.ne.s32.totalorder %s34_s25, %s581_s28  ;;  %p587_p2 = scmp.lt.s32.totalorder %s581_s28, %s581_s28 }
   0x6   :  { %p588_p3 = por %p587_p2, %p586_p1 }
   0x8   :  { %p589_p4 = pnand %p588_p3, %p582_p0 }
   0xa   :  { %592 = shalt.err (!%p589_p4)
}
   0xb   :  { %s639_s29 = smov 64   ;;  %s640_s30 = smov 4  }
   0xc   :  { %39 = dma.hbm_to_vmem [thread:$0]  %s743_s2, 1024, %s34_s25, [#allocation5], %s639_s29, %s639_s29, %s640_s30  }
   0xd   :  { %s601_s10 = scalar_lea.vmem %s22_s27, 1024  ;;  %p606_p6 = scmp.lt.s32.totalorder %s22_s27, %s22_s27 }
   0xe   :  { %p602_p5 = scmp.ne.s32.totalorder %s22_s27, %s601_s10  ;;  %p607_p7 = scmp.lt.s32.totalorder %s601_s10, %s601_s10 }
  0x10   :  { %p608_p8 = por %p607_p7, %p606_p6 }
  0x12   :  { %p609_p9 = pnand %p608_p8, %p602_p5 }
  0x14   :  { %612 = shalt.err (!%p609_p9)
}
  0x15   :  { %27 = dma.hbm_to_vmem [thread:$0]  %s742_s1, 1024, %s22_s27, [#allocation3], %s639_s29, %s639_s29, %s640_s30  }
  0x16   :  { %s641_s13 = smov [#allocation6]  }
  0x17   :  { %s45_s14 = sshll.u32 %s641_s13, 4  ;;  %s46_s14 = int_to_ptr.vmem [resolvable:$true] %s45_s14 }
  0x18   :  { %s621_s15 = scalar_lea.vmem %s46_s14, 1024  ;;  %p626_p11 = scmp.lt.s32.totalorder %s46_s14, %s46_s14 }
  0x19   :  { %p622_p10 = scmp.ne.s32.totalorder %s46_s14, %s621_s15  ;;  %p627_p12 = scmp.lt.s32.totalorder %s621_s15, %s621_s15 }
  0x1b   :  { %p628_p13 = por %p627_p12, %p626_p11 }
  0x1d   :  { %p629_p0 = pnand %p628_p13, %p622_p10 }
  0x1f   :  { %632 = shalt.err (!%p629_p0)
}
  0x20   :  { %51 = dma.hbm_to_vmem [thread:$0]  %s744_s3, 1024, %s46_s14, [#allocation5], %s639_s29, %s639_s29, %s640_s30  }
  0x21   :  { %633 = dma.done.wait [#allocation3], 1024  }
  0x22   :  { %634 = vsyncadd [#allocation3], 4294966272 }
  0x23   :  { %635 = dma.done.wait [#allocation5], 2048  }
  0x24   :  { %636 = vsyncadd [#allocation5], 4294965248  ;;  %v642_v0 = vmov 0.0   ;;  %vm643_vm0 = vmmov 0   ;;  %v548_v1 = vld [vmem:[#allocation2 + $0x38] sm:$0xff]   ;;  %v549_v2 = vld [vmem:[#allocation2 + $0x30] sm:$0xff]  }
  0x25   :  { %481 = vmatprep.subr.bf16.mxu0 %v642_v0  ;;  %497 = vmatprep.mubr.msk.bf16.mxu0 %vm643_vm0, %v642_v0  ;;  %v550_v3 = vld [vmem:[#allocation2 + $0x28] sm:$0xff]   ;;  %v557_v4 = vld [vmem:[#allocation4 + $0x38] sm:$0xff]   ;;  %v551_v5 = vld [vmem:[#allocation2 + $0x20] sm:$0xff]  }
  0x26   :  { %501 = vmatprep.subr.bf16.mxu1 %v642_v0  ;;  %517 = vmatprep.mubr.msk.bf16.mxu1 %vm643_vm0, %v642_v0  ;;  %v558_v6 = vld [vmem:[#allocation4 + $0x30] sm:$0xff]   ;;  %v552_v7 = vld [vmem:[#allocation2 + $0x18] sm:$0xff]   ;;  %v559_v8 = vld [vmem:[#allocation4 + $0x28] sm:$0xff]  }
  0x27   :  { %482 = vmatpush3.bf16.msra.mxu0 %v548_v1  ;;  %502 = vmatpush3.bf16.msra.mxu1 %v557_v4  ;;  %v553_v9 = vld [vmem:[#allocation2 + $0x10] sm:$0xff]   ;;  %v560_v10 = vld [vmem:[#allocation4 + $0x20] sm:$0xff]   ;;  %v554_v11 = vld [vmem:[#allocation2 + $0x8] sm:$0xff]  }
  0x28   :  { %483 = vmatprep.subr.bf16.mxu0 %v642_v0  ;;  %503 = vmatprep.subr.bf16.mxu1 %v642_v0  ;;  %v561_v12 = vld [vmem:[#allocation4 + $0x18] sm:$0xff]   ;;  %v555_v13 = vld [vmem:[#allocation2] sm:$0xff]   ;;  %v562_v15 = vld [vmem:[#allocation4 + $0x10] sm:$0xff]  }
  0x29   :  { %v556_v14 = vld [vmem:[%s741_s0] sm:$0xff]   ;;  %v563_v16 = vld [vmem:[#allocation4 + $0x8] sm:$0xff]   ;;  %v565_v18 = vld [vmem:[#allocation6 + $0x38] sm:$0xff]  }
  0x2a   :  { %v564_v17 = vld [vmem:[#allocation4] sm:$0xff]   ;;  %v566_v19 = vld [vmem:[#allocation6 + $0x30] sm:$0xff]   ;;  %v567_v20 = vld [vmem:[#allocation6 + $0x28] sm:$0xff]  }
  0x2b   :  { %484 = vmatpush3.bf16.msra.mxu0 %v549_v2  ;;  %504 = vmatpush3.bf16.msra.mxu1 %v558_v6  ;;  %v568_v21 = vld [vmem:[#allocation6 + $0x20] sm:$0xff]   ;;  %v569_v22 = vld [vmem:[#allocation6 + $0x18] sm:$0xff]   ;;  %v570_v33 = vld [vmem:[#allocation6 + $0x10] sm:$0xff]  }
  0x2c   :  { %485 = vmatprep.subr.bf16.mxu0 %v642_v0  ;;  %505 = vmatprep.subr.bf16.mxu1 %v642_v0  ;;  %v426_v23 = vld [vmem:[%s745_s4] ss:$0 sm:$0xff]  ;;  %v571_v34 = vld [vmem:[#allocation6 + $0x8] sm:$0xff]  }
  0x2d   :  { %v572_v35 = vld [vmem:[#allocation6] sm:$0xff]  }
  0x2e   :  { %v436_v36 = vld [vmem:[%s746_s5] ss:$0 sm:$0xff] }
  0x2f   :  { %486 = vmatpush3.bf16.msra.mxu0 %v550_v3  ;;  %506 = vmatpush3.bf16.msra.mxu1 %v559_v8  ;;  %v445_v46 = vld [vmem:[%s747_s6] ss:$0 sm:$0xff] }
  0x30   :  { %487 = vmatprep.subr.bf16.mxu0 %v642_v0  ;;  %507 = vmatprep.subr.bf16.mxu1 %v642_v0 }
  0x33   :  { %488 = vmatpush3.bf16.msra.mxu0 %v551_v5  ;;  %508 = vmatpush3.bf16.msra.mxu1 %v560_v10 }
  0x34   :  { %489 = vmatprep.subr.bf16.mxu0 %v642_v0  ;;  %509 = vmatprep.subr.bf16.mxu1 %v642_v0 }
  0x37   :  { %490 = vmatpush3.bf16.msra.mxu0 %v552_v7  ;;  %510 = vmatpush3.bf16.msra.mxu1 %v561_v12 }
  0x38   :  { %491 = vmatprep.subr.bf16.mxu0 %v642_v0  ;;  %511 = vmatprep.subr.bf16.mxu1 %v642_v0 }
  0x3b   :  { %492 = vmatpush3.bf16.msra.mxu0 %v553_v9  ;;  %512 = vmatpush3.bf16.msra.mxu1 %v562_v15 }
  0x3c   :  { %493 = vmatprep.subr.bf16.mxu0 %v642_v0  ;;  %513 = vmatprep.subr.bf16.mxu1 %v642_v0 }
  0x3f   :  { %494 = vmatpush3.bf16.msra.mxu0 %v554_v11  ;;  %514 = vmatpush3.bf16.msra.mxu1 %v563_v16 }
  0x40   :  { %495 = vmatprep.subr.bf16.mxu0 %v642_v0  ;;  %515 = vmatprep.subr.bf16.mxu1 %v642_v0 }
  0x43   :  { %496 = vmatpush3.bf16.msra.mxu0 %v555_v13  ;;  %516 = vmatpush3.bf16.msra.mxu1 %v564_v17 }
  0x44   :  { %521 = vmatprep.subr.bf16.mxu0 %v642_v0 }
  0x46   :  { %498 = vmatmul.mubr.bf16.vlgmr.msra.gmra.mxu0 %v556_v14 }
  0x47   :  { %537 = vmatprep.mubr.msk.bf16.mxu0 %vm643_vm0, %v642_v0  ;;  %522 = vmatpush3.bf16.msra.mxu0 %v565_v18 }
  0x48   :  { %523 = vmatprep.subr.bf16.mxu0 %v642_v0 }
  0x4b   :  { %524 = vmatpush3.bf16.msra.mxu0 %v566_v19 }
  0x4c   :  { %525 = vmatprep.subr.bf16.mxu0 %v642_v0 }
  0x4f   :  { %526 = vmatpush3.bf16.msra.mxu0 %v567_v20 }
  0x50   :  { %527 = vmatprep.subr.bf16.mxu0 %v642_v0 }
  0x53   :  { %528 = vmatpush3.bf16.msra.mxu0 %v568_v21 }
  0x54   :  { %529 = vmatprep.subr.bf16.mxu0 %v642_v0 }
  0x57   :  { %530 = vmatpush3.bf16.msra.mxu0 %v569_v22 }
  0x58   :  { %531 = vmatprep.subr.bf16.mxu0 %v642_v0 }
  0x5b   :  { %532 = vmatpush3.bf16.msra.mxu0 %v570_v33 }
  0x5c   :  { %533 = vmatprep.subr.bf16.mxu0 %v642_v0 }
  0x5f   :  { %534 = vmatpush3.bf16.msra.mxu0 %v571_v34 }
  0x60   :  { %535 = vmatprep.subr.bf16.mxu0 %v642_v0 }
  0x63   :  { %536 = vmatpush3.bf16.msra.mxu0 %v572_v35 }
 0x106   :  { %v181_v24 = vpop.f32.mrf.mxu0 }
 0x107   :  { %v182_v26 = vadd.f32 %v426_v23, %v181_v24 }
 0x108   :  { %v499_v25 = vpop.f32.mrf.mxu0 }
 0x109   :  { %v188_v30 = vmax.f32 %v182_v26, 0.0 }
 0x10a   :  { %v184_v27 = vpop.f32.mrf.mxu0 }
 0x10b   :  { %v185_v28 = vadd.f32 %v426_v23, %v184_v27 }
 0x10c   :  { %v500_v29 = vpop.f32.mrf.mxu0 }
 0x10d   :  { %v189_v31 = vmax.f32 %v185_v28, 0.0 }
 0x10f   :  { %v190_v32 = vpack.c.bf16 %v189_v31, %v188_v30 }
 0x111   :  { %518 = vmatmul.mubr.bf16.vlgmr.msra.gmra.mxu1 %v190_v32 }
 0x1d1   :  { %v296_v37 = vpop.f32.mrf.mxu1 }
 0x1d2   :  { %v297_v39 = vadd.f32 %v436_v36, %v296_v37 }
 0x1d3   :  { %v519_v38 = vpop.f32.mrf.mxu1 }
 0x1d4   :  { %v303_v43 = vmax.f32 %v297_v39, 0.0 }
 0x1d5   :  { %v299_v40 = vpop.f32.mrf.mxu1 }
 0x1d6   :  { %v300_v41 = vadd.f32 %v436_v36, %v299_v40 }
 0x1d7   :  { %v520_v42 = vpop.f32.mrf.mxu1 }
 0x1d8   :  { %v304_v44 = vmax.f32 %v300_v41, 0.0 }
 0x1da   :  { %v305_v45 = vpack.c.bf16 %v304_v44, %v303_v43 }
 0x1dc   :  { %538 = vmatmul.mubr.bf16.vlgmr.msra.gmra.mxu0 %v305_v45 }
 0x29c   :  { %v411_v47 = vpop.f32.mrf.mxu0 }
 0x29d   :  { %v412_v48 = vadd.f32 %v445_v46, %v411_v47 }
 0x29e   :  { %v539_v49 = vpop.f32.mrf.mxu0 }
 0x29f   :  { %418 = vst [vmem:[%s748_s7] sm:$0xff] %v412_v48 }
 0x2a0   :  { %v414_v50 = vpop.f32.mrf.mxu0 }
 0x2a1   :  { %v415_v51 = vadd.f32 %v445_v46, %v414_v50 }
 0x2a2   :  { %v540_v52 = vpop.f32.mrf.mxu0 }
 0x2a3   :  { %419 = vst [vmem:[%s748_s7 + $0x8] sm:$0xff] %v415_v51 }
 0x2a4   :  { %424 = vsyncpa [#allocation3], 1 }
 0x2a5   :  { %425 = vsyncpa [#allocation5], 1 }

</bundles_post_ra>
